<compile_context>
chip_gen: v7x
topology: tpu7x:2x2x1
jax: 0.10.0
libtpu: 0.0.40
codegen_flags: <defaults>
</compile_context>

<pallas_src>
import jax
import jax.numpy as jnp
from jax import lax
from jax.experimental import pallas as pl
from jax.experimental.pallas import tpu as pltpu

LRELU_SLOPE = 0.2
BN_EPS = 1e-5


def _leaky_relu(z):
    # 2 VPU ops/element (mul + max) instead of 3 (cmp + mul + select).
    return jnp.maximum(z, LRELU_SLOPE * z)


# ---- stage 1: conv1 + lrelu -> per-tile sum(h1) and Gram(h1) BN partials ----
def stage1_kernel(x_ref, w1t_ref, b1_ref, s1_ref, g_ref):
    xb = x_ref[0].astype(jnp.bfloat16)                      # (C, T) bf16
    z = jnp.dot(w1t_ref[...], xb, preferred_element_type=jnp.float32)
    h1 = _leaky_relu(z + b1_ref[...])                       # (ndf, T) f32
    # Per-channel sum of h1 over the pixel tile (f32, XLU lane reduce).
    s1_ref[0] = jnp.sum(h1, axis=1, keepdims=True)          # (ndf, 1)
    # Gram over the pixel axis: G = h1 @ h1^T — K = tile_hw deep MXU matmul,
    # bf16 inputs, f32 accumulation (stat sums themselves stay f32).
    h1b = h1.astype(jnp.bfloat16)
    g_ref[0] = lax.dot_general(h1b, h1b, (((1,), (1,)), ((), ())),
                               preferred_element_type=jnp.float32)  # (ndf,ndf)


# ---- stage 2: recompute conv1+lrelu+conv2 (BN scale folded), shift, lrelu,
# ---- conv3 -> lane-dense (1, tile_hw) output ---------------------------------
def stage2_kernel(x_ref, w1t_ref, b1_ref, w2st_ref, shift_ref, w3_ref, b3_ref,
                  out_ref):
    xb = x_ref[0].astype(jnp.bfloat16)                      # (C, T)
    z = jnp.dot(w1t_ref[...], xb, preferred_element_type=jnp.float32)
    h1 = _leaky_relu(z + b1_ref[...])                       # (ndf, T) f32
    h2 = jnp.dot(w2st_ref[...], h1.astype(jnp.bfloat16),
                 preferred_element_type=jnp.float32) + shift_ref[...]
    h3 = _leaky_relu(h2)                                     # (ndf2, T) f32
    y = jnp.dot(w3_ref[...], h3.astype(jnp.bfloat16),
                preferred_element_type=jnp.float32)          # (1, T) lane-dense
    out_ref[0] = y + b3_ref[0, 0]


def _pick_tile_hw(hw, target=4096):
    # target 4096: sweeps 4096-8192 can help on v5e/v6e; 4096 keeps v7x's
    # smaller (64 MiB physical) VMEM comfortable.
    if hw <= target:
        return hw
    for t in range(target, 127, -128):
        if hw % t == 0:
            return t
    return hw


def pixel_discriminator_forward(x_nchw, params, *, tile_hw=None):
    w1, b1, w2 = params["w1"], params["b1"], params["w2"]
    gamma, beta = params["gamma"], params["beta"]
    w3, b3 = params["w3"], params["b3"]

    N, C, H, W = x_nchw.shape
    HW = H * W
    P = N * HW
    ndf = w1.shape[1]
    ndf2 = w2.shape[1]

    if tile_hw is None:
        tile_hw = _pick_tile_hw(HW)
    assert HW % tile_hw == 0, "tile_hw must divide H*W"
    assert tile_hw % 128 == 0 or tile_hw == HW, "tile must be lane-aligned or full"
    t_hw = HW // tile_hw
    t_total = N * t_hw
    grid = (N, t_hw)

    # Channel-major view: NCHW -> (N, C, H*W) is a pure reshape (no transpose
    # kernel, no extra HBM pass).  Pixels land on lanes, C on sublanes.
    x = x_nchw.reshape(N, C, HW)

    # bf16 matmul operands (in-kernel accumulation is f32); biases stay f32.
    w1f = jnp.asarray(w1, jnp.float32)
    w2f = jnp.asarray(w2, jnp.float32)
    w1t = w1f.T.astype(jnp.bfloat16)                 # (ndf, C)
    b1c = jnp.asarray(b1, jnp.float32).reshape(ndf, 1)

    # ---------------- stage 1: per-tile BN partials over h1 ------------------
    s1p, gp = pl.pallas_call(
        stage1_kernel,
        out_shape=(
            jax.ShapeDtypeStruct((t_total, ndf, 1), jnp.float32),
            jax.ShapeDtypeStruct((t_total, ndf, ndf), jnp.float32),
        ),
        grid_spec=pltpu.PrefetchScalarGridSpec(
            num_scalar_prefetch=0,
            grid=grid,
            in_specs=[
                pl.BlockSpec((1, C, tile_hw), lambda n, i: (n, 0, i)),
                pl.BlockSpec((ndf, C), lambda n, i: (0, 0)),
                pl.BlockSpec((ndf, 1), lambda n, i: (0, 0)),
            ],
            out_specs=(
                pl.BlockSpec((1, ndf, 1), lambda n, i: (n * t_hw + i, 0, 0)),
                pl.BlockSpec((1, ndf, ndf), lambda n, i: (n * t_hw + i, 0, 0)),
            ),
        ),
        compiler_params=pltpu.CompilerParams(
            dimension_semantics=("parallel", "parallel")),
    )(x, w1t, b1c)

    # ---- glue: derive BatchNorm scale/shift from sum(h1) and Gram(h1) -------
    # sum_p h2[c]   = (sum_p h1) @ w2
    # sum_p h2[c]^2 = w2[:,c]^T (sum_tiles G) w2[:,c]
    sum_h1 = jnp.sum(s1p, axis=0)[:, 0]              # (ndf,)   f32
    G = jnp.sum(gp, axis=0)                          # (ndf, ndf) f32
    s1 = sum_h1 @ w2f                                # (ndf2,)
    s2 = jnp.sum(w2f * (G @ w2f), axis=0)            # (ndf2,)
    mean = s1 / P
    # TODO(synk): E[x^2]-E[x]^2 can cancel catastrophically when |mean|>>std;
    # a Chan-style centered-moment combine would be more robust for huge P.
    var = jnp.maximum(s2 / P - mean * mean, 0.0)
    inv_std = lax.rsqrt(var + BN_EPS)
    scale = gamma * inv_std
    shift = beta - mean * scale
    w2st = (w2f * scale[None, :]).T.astype(jnp.bfloat16)   # (ndf2, ndf), scale folded
    shiftc = shift.reshape(ndf2, 1).astype(jnp.float32)
    w3row = jnp.asarray(w3, jnp.float32).reshape(1, ndf2).astype(jnp.bfloat16)
    b3s = jnp.asarray(b3, jnp.float32).reshape(1, 1)
    # TODO(synk): BatchNorm running_mean/running_var updates (training-time
    # side effect of the PyTorch module) are not materialized.

    # -------- stage 2: recompute conv1+lrelu+conv2, BN shift, lrelu, conv3 ---
    out = pl.pallas_call(
        stage2_kernel,
        out_shape=jax.ShapeDtypeStruct((N, 1, HW), jnp.float32),
        grid_spec=pltpu.PrefetchScalarGridSpec(
            num_scalar_prefetch=0,
            grid=grid,
            in_specs=[
                pl.BlockSpec((1, C, tile_hw), lambda n, i: (n, 0, i)),
                pl.BlockSpec((ndf, C), lambda n, i: (0, 0)),
                pl.BlockSpec((ndf, 1), lambda n, i: (0, 0)),
                pl.BlockSpec((ndf2, ndf), lambda n, i: (0, 0)),
                pl.BlockSpec((ndf2, 1), lambda n, i: (0, 0)),
                pl.BlockSpec((1, ndf2), lambda n, i: (0, 0)),
                pl.BlockSpec(memory_space=pltpu.MemorySpace.SMEM),
            ],
            out_specs=pl.BlockSpec((1, 1, tile_hw), lambda n, i: (n, 0, i)),
        ),
        compiler_params=pltpu.CompilerParams(
            dimension_semantics=("parallel", "parallel")),
    )(x, w1t, b1c, w2st, shiftc, w3row, b3s)

    # (N, 1, H*W) pixel-major -> NCHW (N, 1, H, W): free reshape.
    return out.reshape(N, 1, H, W)


# ---------------- pure-JAX f32 reference for correctness check ----------------
def reference_forward(x_nchw, params):
    w1, b1, w2 = params["w1"], params["b1"], params["w2"]
    gamma, beta = params["gamma"], params["beta"]
    w3, b3 = params["w3"], params["b3"]
    x = jnp.transpose(x_nchw, (0, 2, 3, 1)).astype(jnp.float32)  # NHWC
    h1 = jax.nn.leaky_relu(x @ w1 + b1, negative_slope=LRELU_SLOPE)
    h2 = h1 @ w2
    mean = jnp.mean(h2, axis=(0, 1, 2))
    var = jnp.var(h2, axis=(0, 1, 2))  # biased, like BN training mode
    h2n = (h2 - mean) * lax.rsqrt(var + BN_EPS) * gamma + beta
    h3 = jax.nn.leaky_relu(h2n, negative_slope=LRELU_SLOPE)
    y = h3 @ w3.reshape(-1, 1) + b3
    return jnp.transpose(y, (0, 3, 1, 2))


# ---------------- deterministic parameter init (PyTorch-ish uniform) ----------
def init_params(key, input_nc, ndf):
    ks = jax.random.split(key, 6)

    def unif(k, shape, fan_in):
        bound = 1.0 / jnp.sqrt(fan_in)
        return jax.random.uniform(k, shape, jnp.float32, -bound, bound)

    ndf2 = 2 * ndf
    return {
        # weights stored as (C_in, C_out) = transpose of PyTorch (C_out, C_in, 1, 1)
        "w1": unif(ks[0], (input_nc, ndf), input_nc),
        "b1": unif(ks[1], (ndf,), input_nc),
        "w2": unif(ks[2], (ndf, ndf2), ndf),          # bias=False (BatchNorm path)
        "gamma": jnp.ones((ndf2,), jnp.float32),
        "beta": jnp.zeros((ndf2,), jnp.float32),
        "w3": unif(ks[3], (ndf2,), ndf2),             # single output channel
        "b3": unif(ks[4], (1,), ndf2),
    }


if __name__ == "__main__":
    key = jax.random.PRNGKey(0)
    k_x, k_p = jax.random.split(key)

    N, C, H, W = 2, 4, 16, 16   # small shapes: batch=2, input_nc=4, spatial=16
    ndf = 64

    params = init_params(k_p, C, ndf)
    x = jax.random.normal(k_x, (N, C, H, W), jnp.float32)

    fwd = jax.jit(pixel_discriminator_forward)
    out = jax.block_until_ready(fwd(x, params))
    ref = jax.block_until_ready(reference_forward(x, params))

    assert out.shape == (N, 1, H, W), out.shape
    # bf16 MXU inputs (f32 accumulation) drift slightly from the pure-f32
    # reference; tolerance loosened accordingly (errors of a wrong kernel
    # would be O(1), so this remains a meaningful check).
    assert jnp.allclose(out, ref, rtol=5e-2, atol=5e-2), \
        float(jnp.max(jnp.abs(out - ref)))
    print("KERNEL_OK")
</pallas_src>

<mosaic_0001>
module attributes {stable_mosaic.version = 11 : i64} {
  func.func @stage1_kernel(%arg0: i32, %arg1: i32, %arg2: memref<1x4x256xf32, #tpu.memory_space<vmem>>, %arg3: memref<64x4xbf16, #tpu.memory_space<vmem>>, %arg4: memref<64x1xf32, #tpu.memory_space<vmem>>, %arg5: memref<1x64x1xf32, #tpu.memory_space<vmem>>, %arg6: memref<1x64x64xf32, #tpu.memory_space<vmem>>) attributes {dimension_semantics = [#tpu.dimension_semantics<parallel>, #tpu.dimension_semantics<parallel>], iteration_bounds = array<i64: 2, 1>, scalar_prefetch = 0 : i64, scratch_operands = 0 : i64, tpu.core_type = #tpu.core_type<tc>, window_params = [{transform_indices = @transform_0, window_bounds = array<i64: 1, 4, 256>}, {pipeline_mode = #tpu.pipeline_mode<synchronous>, transform_indices = @transform_1, window_bounds = array<i64: 64, 4>}, {pipeline_mode = #tpu.pipeline_mode<synchronous>, transform_indices = @transform_2, window_bounds = array<i64: 64, 1>}, {transform_indices = @transform_3, window_bounds = array<i64: 1, 64, 1>}, {transform_indices = @transform_4, window_bounds = array<i64: 1, 64, 64>}]} {
    %c0 = arith.constant 0 : index
    %c0_0 = arith.constant 0 : index
    %c0_1 = arith.constant 0 : index
    %0 = vector.load %arg2[%c0, %c0_0, %c0_1] : memref<1x4x256xf32, #tpu.memory_space<vmem>>, vector<1x4x256xf32>
    %1 = vector.shape_cast %0 : vector<1x4x256xf32> to vector<4x256xf32>
    %2 = arith.truncf %1 : vector<4x256xf32> to vector<4x256xbf16>
    %c0_2 = arith.constant 0 : index
    %c0_3 = arith.constant 0 : index
    %3 = vector.load %arg3[%c0_2, %c0_3] : memref<64x4xbf16, #tpu.memory_space<vmem>>, vector<64x4xbf16>
    %cst = arith.constant dense<0.000000e+00> : vector<64x256xf32>
    %4 = tpu.matmul %3, %2, %cst {dimension_numbers = #tpu.dot_dimension_numbers<[1], [0], [0], [1], [0, 0, 1, 1], [], []>} : vector<64x4xbf16>, vector<4x256xbf16>, vector<64x256xf32> -> vector<64x256xf32>
    %c0_4 = arith.constant 0 : index
    %c0_5 = arith.constant 0 : index
    %5 = vector.load %arg4[%c0_4, %c0_5] : memref<64x1xf32, #tpu.memory_space<vmem>>, vector<64x1xf32>
    %6 = vector.broadcast %5 : vector<64x1xf32> to vector<64x256xf32>
    %7 = arith.addf %4, %6 : vector<64x256xf32>
    %cst_6 = arith.constant 2.000000e-01 : f32
    %8 = vector.broadcast %cst_6 : f32 to vector<64x256xf32>
    %9 = arith.mulf %8, %7 : vector<64x256xf32>
    %10 = arith.maximumf %7, %9 : vector<64x256xf32>
    %cst_7 = arith.constant dense<0.000000e+00> : vector<64xf32>
    %11 = vector.multi_reduction <add>, %10, %cst_7 [1] : vector<64x256xf32> to vector<64xf32>
    %12 = vector.shape_cast %11 : vector<64xf32> to vector<64x1xf32>
    %c0_8 = arith.constant 0 : index
    %c0_9 = arith.constant 0 : index
    %c0_10 = arith.constant 0 : index
    %13 = vector.load %arg5[%c0_8, %c0_9, %c0_10] : memref<1x64x1xf32, #tpu.memory_space<vmem>>, vector<1x64x1xf32>
    %14 = vector.shape_cast %13 : vector<1x64x1xf32> to vector<64x1xf32>
    %15 = vector.shape_cast %12 : vector<64x1xf32> to vector<1x64x1xf32>
    tpu.vector_store %arg5[%c0_8, %c0_9, %c0_10], %15 {strides = array<i32>} : memref<1x64x1xf32, #tpu.memory_space<vmem>>, vector<1x64x1xf32>,
    %16 = arith.truncf %10 : vector<64x256xf32> to vector<64x256xbf16>
    %cst_11 = arith.constant dense<0.000000e+00> : vector<64x64xf32>
    %17 = tpu.matmul %16, %16, %cst_11 {dimension_numbers = #tpu.dot_dimension_numbers<[1], [1], [0], [0], [0, 0, 1, 0], [], []>} : vector<64x256xbf16>, vector<64x256xbf16>, vector<64x64xf32> -> vector<64x64xf32>
    %c0_12 = arith.constant 0 : index
    %c0_13 = arith.constant 0 : index
    %c0_14 = arith.constant 0 : index
    %18 = vector.load %arg6[%c0_12, %c0_13, %c0_14] : memref<1x64x64xf32, #tpu.memory_space<vmem>>, vector<1x64x64xf32>
    %19 = vector.shape_cast %18 : vector<1x64x64xf32> to vector<64x64xf32>
    %20 = vector.shape_cast %17 : vector<64x64xf32> to vector<1x64x64xf32>
    tpu.vector_store %arg6[%c0_12, %c0_13, %c0_14], %20 {strides = array<i32>} : memref<1x64x64xf32, #tpu.memory_space<vmem>>, vector<1x64x64xf32>,
    return
  }
  func.func @transform_0(%arg0: i32, %arg1: i32) -> (i32, i32, i32) {
    %c0_i32 = arith.constant 0 : i32
    %c0_i32_0 = arith.constant 0 : i32
    return %arg0, %c0_i32, %arg1 : i32, i32, i32
  }
  func.func @transform_1(%arg0: i32, %arg1: i32) -> (i32, i32) {
    %c0_i32 = arith.constant 0 : i32
    %c0_i32_0 = arith.constant 0 : i32
    %c0_i32_1 = arith.constant 0 : i32
    return %c0_i32, %c0_i32_0 : i32, i32
  }
  func.func @transform_2(%arg0: i32, %arg1: i32) -> (i32, i32) {
    %c0_i32 = arith.constant 0 : i32
    %c0_i32_0 = arith.constant 0 : i32
    %c0_i32_1 = arith.constant 0 : i32
    return %c0_i32, %c0_i32_0 : i32, i32
  }
  func.func @transform_3(%arg0: i32, %arg1: i32) -> (i32, i32, i32) {
    %c1_i32 = arith.constant 1 : i32
    %0 = arith.muli %arg0, %c1_i32 : i32
    %1 = arith.addi %0, %arg1 : i32
    %c0_i32 = arith.constant 0 : i32
    %c0_i32_0 = arith.constant 0 : i32
    %c0_i32_1 = arith.constant 0 : i32
    return %1, %c0_i32, %c0_i32_0 : i32, i32, i32
  }
  func.func @transform_4(%arg0: i32, %arg1: i32) -> (i32, i32, i32) {
    %c1_i32 = arith.constant 1 : i32
    %0 = arith.muli %arg0, %c1_i32 : i32
    %1 = arith.addi %0, %arg1 : i32
    %c0_i32 = arith.constant 0 : i32
    %c0_i32_0 = arith.constant 0 : i32
    %c0_i32_1 = arith.constant 0 : i32
    return %1, %c0_i32, %c0_i32_0 : i32, i32, i32
  }
}

module attributes {stable_mosaic.version = 11 : i64} {
  func.func @stage2_kernel(%arg0: i32, %arg1: i32, %arg2: memref<1x4x256xf32, #tpu.memory_space<vmem>>, %arg3: memref<64x4xbf16, #tpu.memory_space<vmem>>, %arg4: memref<64x1xf32, #tpu.memory_space<vmem>>, %arg5: memref<128x64xbf16, #tpu.memory_space<vmem>>, %arg6: memref<128x1xf32, #tpu.memory_space<vmem>>, %arg7: memref<1x128xbf16, #tpu.memory_space<vmem>>, %arg8: memref<1x1xf32, #tpu.memory_space<smem>>, %arg9: memref<1x1x256xf32, #tpu.memory_space<vmem>>) attributes {dimension_semantics = [#tpu.dimension_semantics<parallel>, #tpu.dimension_semantics<parallel>], iteration_bounds = array<i64: 2, 1>, scalar_prefetch = 0 : i64, scratch_operands = 0 : i64, tpu.core_type = #tpu.core_type<tc>, window_params = [{transform_indices = @transform_0, window_bounds = array<i64: 1, 4, 256>}, {pipeline_mode = #tpu.pipeline_mode<synchronous>, transform_indices = @transform_1, window_bounds = array<i64: 64, 4>}, {pipeline_mode = #tpu.pipeline_mode<synchronous>, transform_indices = @transform_2, window_bounds = array<i64: 64, 1>}, {pipeline_mode = #tpu.pipeline_mode<synchronous>, transform_indices = @transform_3, window_bounds = array<i64: 128, 64>}, {pipeline_mode = #tpu.pipeline_mode<synchronous>, transform_indices = @transform_4, window_bounds = array<i64: 128, 1>}, {pipeline_mode = #tpu.pipeline_mode<synchronous>, transform_indices = @transform_5, window_bounds = array<i64: 1, 128>}, {transform_indices = @transform_6, window_bounds = array<i64: 1, 1>}, {transform_indices = @transform_7, window_bounds = array<i64: 1, 1, 256>}]} {
    %c0 = arith.constant 0 : index
    %c0_0 = arith.constant 0 : index
    %c0_1 = arith.constant 0 : index
    %0 = vector.load %arg2[%c0, %c0_0, %c0_1] : memref<1x4x256xf32, #tpu.memory_space<vmem>>, vector<1x4x256xf32>
    %1 = vector.shape_cast %0 : vector<1x4x256xf32> to vector<4x256xf32>
    %2 = arith.truncf %1 : vector<4x256xf32> to vector<4x256xbf16>
    %c0_2 = arith.constant 0 : index
    %c0_3 = arith.constant 0 : index
    %3 = vector.load %arg3[%c0_2, %c0_3] : memref<64x4xbf16, #tpu.memory_space<vmem>>, vector<64x4xbf16>
    %cst = arith.constant dense<0.000000e+00> : vector<64x256xf32>
    %4 = tpu.matmul %3, %2, %cst {dimension_numbers = #tpu.dot_dimension_numbers<[1], [0], [0], [1], [0, 0, 1, 1], [], []>} : vector<64x4xbf16>, vector<4x256xbf16>, vector<64x256xf32> -> vector<64x256xf32>
    %c0_4 = arith.constant 0 : index
    %c0_5 = arith.constant 0 : index
    %5 = vector.load %arg4[%c0_4, %c0_5] : memref<64x1xf32, #tpu.memory_space<vmem>>, vector<64x1xf32>
    %6 = vector.broadcast %5 : vector<64x1xf32> to vector<64x256xf32>
    %7 = arith.addf %4, %6 : vector<64x256xf32>
    %cst_6 = arith.constant 2.000000e-01 : f32
    %8 = vector.broadcast %cst_6 : f32 to vector<64x256xf32>
    %9 = arith.mulf %8, %7 : vector<64x256xf32>
    %10 = arith.maximumf %7, %9 : vector<64x256xf32>
    %c0_7 = arith.constant 0 : index
    %c0_8 = arith.constant 0 : index
    %11 = vector.load %arg5[%c0_7, %c0_8] : memref<128x64xbf16, #tpu.memory_space<vmem>>, vector<128x64xbf16>
    %12 = arith.truncf %10 : vector<64x256xf32> to vector<64x256xbf16>
    %cst_9 = arith.constant dense<0.000000e+00> : vector<128x256xf32>
    %13 = tpu.matmul %11, %12, %cst_9 {dimension_numbers = #tpu.dot_dimension_numbers<[1], [0], [0], [1], [0, 0, 1, 1], [], []>} : vector<128x64xbf16>, vector<64x256xbf16>, vector<128x256xf32> -> vector<128x256xf32>
    %c0_10 = arith.constant 0 : index
    %c0_11 = arith.constant 0 : index
    %14 = vector.load %arg6[%c0_10, %c0_11] : memref<128x1xf32, #tpu.memory_space<vmem>>, vector<128x1xf32>
    %15 = vector.broadcast %14 : vector<128x1xf32> to vector<128x256xf32>
    %16 = arith.addf %13, %15 : vector<128x256xf32>
    %cst_12 = arith.constant 2.000000e-01 : f32
    %17 = vector.broadcast %cst_12 : f32 to vector<128x256xf32>
    %18 = arith.mulf %17, %16 : vector<128x256xf32>
    %19 = arith.maximumf %16, %18 : vector<128x256xf32>
    %c0_13 = arith.constant 0 : index
    %c0_14 = arith.constant 0 : index
    %20 = vector.load %arg7[%c0_13, %c0_14] : memref<1x128xbf16, #tpu.memory_space<vmem>>, vector<1x128xbf16>
    %21 = arith.truncf %19 : vector<128x256xf32> to vector<128x256xbf16>
    %cst_15 = arith.constant dense<0.000000e+00> : vector<1x256xf32>
    %22 = tpu.matmul %20, %21, %cst_15 {dimension_numbers = #tpu.dot_dimension_numbers<[1], [0], [0], [1], [0, 0, 1, 1], [], []>} : vector<1x128xbf16>, vector<128x256xbf16>, vector<1x256xf32> -> vector<1x256xf32>
    %c0_16 = arith.constant 0 : index
    %c0_17 = arith.constant 0 : index
    %23 = memref.load %arg8[%c0_16, %c0_17] : memref<1x1xf32, #tpu.memory_space<smem>>
    %24 = vector.broadcast %23 : f32 to vector<1x256xf32>
    %25 = arith.addf %22, %24 : vector<1x256xf32>
    %c0_18 = arith.constant 0 : index
    %c0_19 = arith.constant 0 : index
    %c0_20 = arith.constant 0 : index
    %26 = vector.load %arg9[%c0_18, %c0_19, %c0_20] : memref<1x1x256xf32, #tpu.memory_space<vmem>>, vector<1x1x256xf32>
    %27 = vector.shape_cast %26 : vector<1x1x256xf32> to vector<1x256xf32>
    %28 = vector.shape_cast %25 : vector<1x256xf32> to vector<1x1x256xf32>
    tpu.vector_store %arg9[%c0_18, %c0_19, %c0_20], %28 {strides = array<i32>} : memref<1x1x256xf32, #tpu.memory_space<vmem>>, vector<1x1x256xf32>,
    return
  }
  func.func @transform_0(%arg0: i32, %arg1: i32) -> (i32, i32, i32) {
    %c0_i32 = arith.constant 0 : i32
    %c0_i32_0 = arith.constant 0 : i32
    return %arg0, %c0_i32, %arg1 : i32, i32, i32
  }
  func.func @transform_1(%arg0: i32, %arg1: i32) -> (i32, i32) {
    %c0_i32 = arith.constant 0 : i32
    %c0_i32_0 = arith.constant 0 : i32
    %c0_i32_1 = arith.constant 0 : i32
    return %c0_i32, %c0_i32_0 : i32, i32
  }
  func.func @transform_2(%arg0: i32, %arg1: i32) -> (i32, i32) {
    %c0_i32 = arith.constant 0 : i32
    %c0_i32_0 = arith.constant 0 : i32
    %c0_i32_1 = arith.constant 0 : i32
    return %c0_i32, %c0_i32_0 : i32, i32
  }
  func.func @transform_3(%arg0: i32, %arg1: i32) -> (i32, i32) {
    %c0_i32 = arith.constant 0 : i32
    %c0_i32_0 = arith.constant 0 : i32
    %c0_i32_1 = arith.constant 0 : i32
    return %c0_i32, %c0_i32_0 : i32, i32
  }
  func.func @transform_4(%arg0: i32, %arg1: i32) -> (i32, i32) {
    %c0_i32 = arith.constant 0 : i32
    %c0_i32_0 = arith.constant 0 : i32
    %c0_i32_1 = arith.constant 0 : i32
    return %c0_i32, %c0_i32_0 : i32, i32
  }
  func.func @transform_5(%arg0: i32, %arg1: i32) -> (i32, i32) {
    %c0_i32 = arith.constant 0 : i32
    %c0_i32_0 = arith.constant 0 : i32
    %c0_i32_1 = arith.constant 0 : i32
    return %c0_i32, %c0_i32_0 : i32, i32
  }
  func.func @transform_6(%arg0: i32, %arg1: i32) -> (i32, i32) {
    %c0_i32 = arith.constant 0 : i32
    %c0_i32_0 = arith.constant 0 : i32
    %c0_i32_1 = arith.constant 0 : i32
    return %c0_i32, %c0_i32_0 : i32, i32
  }
  func.func @transform_7(%arg0: i32, %arg1: i32) -> (i32, i32, i32) {
    %c0_i32 = arith.constant 0 : i32
    %c0_i32_0 = arith.constant 0 : i32
    return %arg0, %c0_i32, %arg1 : i32, i32, i32
  }
}

</mosaic_0001>

<bundles_post_ra>
// kernel: pixel_discriminator_forward.2
= control target key start
LH: loop header
LB: loop body
LE: loop exit
PB: predicated region body
PF: predicated region fallthrough
CT: control target
= control target key end

     0   :  { %s796_s15 = smov 0   ;;  %s798_s16 = smov 0   ;;  %s902_s0 = inlined_call_operand.vmem [shape: f32[2,4,256], index: 0, kind: input, shape index: {}]   ;;  %s903_s1 = inlined_call_operand.vmem [shape: bf16[64,4], index: 1, kind: input, shape index: {}]   ;;  %s904_s2 = inlined_call_operand.vmem [shape: f32[64,1], index: 2, kind: input, shape index: {}]   ;;  %s905_s3 = inlined_call_operand.vmem [shape: f32[2,64,1], index: 3, kind: output, shape index: {0}]   ;;  %s906_s4 = inlined_call_operand.vmem [shape: f32[2,64,64], index: 4, kind: output, shape index: {1}]  }
   0x1   :  { %s800_s17 = smov 0  }
   0x2 LB: > { %s27_s18 = sadd.s32 1, %s764_s16  ;;  %p685_p0 = scmp.ge.s32.totalorder %s768_s17, 1  ;;  %s768_s17 = sphi %s800_s17, %s15_s17   ;;  %s764_s16 = sphi %s798_s16, %s908_s16   ;;  %s760_s15 = sphi %s796_s15, %s907_s15  }
   0x3   : > { %p29_p1 = scmp.ge.s32.totalorder %s27_s18, 2  ;;  %p188_p2 = scmp.lt.s32.totalorder %s768_s17, 3 }
   0x5   : > { %s910_s18 = smov (%p29_p1, %s27_s18), 0  ;;  %p189_p3 = pnand %p685_p0, %p188_p2 }
   0x6   : > { %p226_p4 = scmp.lt.s32.totalorder (!%p189_p3), %s760_s15, 1  ;;  %v770_v0 = vmov (!%p189_p3), 0   ;;  %v264_v1 = vld [vmem:[%s904_s2] sm:$0xff] (!%p189_p3)  ;;  %v266_v2 = vld [vmem:[%s904_s2 + $0x10] sm:$0xff] (!%p189_p3)  ;;  %vm345_vm0 = vcmask (!%p189_p3), 1041408   ;;  %v265_v4 = vld [vmem:[%s904_s2 + $0x8] sm:$0xff] (!%p189_p3) }
   0x7   : > { %192 = sbr.rel (%p189_p3) target bundleno = 513 (0x201), region = 32  ;;  %384 = vmatprep.mubr.bf16.mxu0 (!%p189_p3), %v770_v0  ;;  %739 = vset.pattern.permute.xlu0 (!%p189_p3), %v770_v0  ;;  %v267_v7 = vld [vmem:[%s904_s2 + $0x18] sm:$0xff] (!%p189_p3)  ;;  %v268_v10 = vld [vmem:[%s904_s2 + $0x20] sm:$0xff] (!%p189_p3)  ;;  %v269_v12 = vld [vmem:[%s904_s2 + $0x28] sm:$0xff] (!%p189_p3)  ;;  %vm332_vm1 = vcmask (!%p189_p3), 31744   ;;  %vm481_vm2 = vcmask (!%p189_p3), 7168  }
   0x8   : > { %740 = vset.pattern.permute.xlu1 (!%p189_p3), %v770_v0  ;;  %274 = vperm.xlu0 (!%p189_p3), %739, %v264_v1   ;;  %v742_v11 = vld [vmem:[%s903_s1] sm:$0xff] (!%p189_p3)   ;;  %v270_v13 = vld [vmem:[%s904_s2 + $0x30] sm:$0xff] (!%p189_p3)  ;;  %v271_v14 = vld [vmem:[%s904_s2 + $0x38] sm:$0xff] (!%p189_p3)  ;;  %vm563_vm3 = vcmask (!%p189_p3), 523264  }
   0x9   : > { %284 = vperm.xlu1 (!%p189_p3), %740, %v266_v2   ;;  %v743_v15 = vld [vmem:[%s903_s1 + $0x8] sm:$0xff] (!%p189_p3)   ;;  %v744_v16 = vld [vmem:[%s903_s1 + $0x10] sm:$0xff] (!%p189_p3)   ;;  %v745_v17 = vld [vmem:[%s903_s1 + $0x18] sm:$0xff] (!%p189_p3)  }
   0xc   : > { %279 = vperm.xlu0 (!%p189_p3), %739, %v265_v4  }
   0xd   : > { %289 = vperm.xlu1 (!%p189_p3), %740, %v267_v7  }
   0xe   : > { %s912_s15 = smov (!%p226_p4, %s760_s15), 1 }
   0xf   : > { %s703_s19 = sshll.u32 %s912_s15, 3  ;;  %s704_s25 = sshll.u32 %s912_s15, 6 }
  0x10   : > { %s233_s24 = scalar_lea.vmem %s902_s0, %s703_s19  ;;  %294 = vperm.xlu0 %739, %v268_v10   ;;  %s240_s28 = scalar_lea.vmem %s905_s3, %s704_s25 }
  0x11   : > { %v250_v3 = vld [vmem:[%s233_s24] sm:$0xff]  ;;  %299 = vperm.xlu1 %740, %v269_v12   ;;  %s247_s30 = scalar_lea.vmem %s906_s4, %s704_s25 }
  0x12   : > { %v252_v5 = vcombine.high %v250_v3, %v250_v3  ;;  %v254_v6 = vpack.c.bf16 %v250_v3, %v250_v3 }
  0x14   : > { %v255_v8 = vpack.c.bf16 %v252_v5, %v252_v5  ;;  %v347_v9 = vsel %vm345_vm0, %v254_v6, 0  ;;  %304 = vperm.xlu0 %739, %v270_v13  }
  0x15   : > { %309 = vperm.xlu1 %740, %v271_v14  }
  0x16   : > { %696 = vmatprep.subr.msk.bf16.mxu0 %vm345_vm0, %v255_v8 }
  0x17   : > { %353 = vmatpush1.bf16.msra.mxu0 %v347_v9 }
  0x1a   : > { %697 = vmatmul.mubr.msk.bf16.vlgmr.msra.gmra.mrb[0].mxu0 %vm332_vm1, %v742_v11 }
  0x1b   : > { %394 = vmatprep.mubr.bf16.mxu0 %v770_v0 }
  0x22   : > { %698 = vmatmul.mubr.msk.bf16.gmra.mrb[4].mxu0 %vm332_vm1, %v743_v15 }
  0x23   : > { %404 = vmatprep.mubr.bf16.mxu0 %v770_v0 }
  0x2a   : > { %699 = vmatmul.mubr.msk.bf16.gmra.mrb[8].mxu0 %vm332_vm1, %v744_v16 }
  0x2b   : > { %414 = vmatprep.mubr.bf16.mxu0 %v770_v0 }
  0x32   : > { %700 = vmatmul.mubr.msk.bf16.gmra.mrb[12].mxu0 %vm332_vm1, %v745_v17 }
  0x87   : > { %v275_v18 = vpop.permute.xlu0 %274 }
  0x88   : > { %v285_v28 = vpop.permute.xlu1 %284 }
  0x8b   : > { %v280_v22 = vpop.permute.xlu0 %279 }
  0x8c   : > { %v290_v42 = vpop.permute.xlu1 %289 }
  0x8f   : > { %v295_v57 = vpop.permute.xlu0 %294 }
  0x90   : > { %v300_v0 = vpop.permute.xlu1 %299 }
  0x93   : > { %v305_v15 = vpop.permute.xlu0 %304 }
  0xed   : > { %v386_v19 = vpop.f32.mrb[0].mxu0 }
  0xee   : > { %v387_v20 = vadd.f32 %v386_v19, %v275_v18  ;;  %v388_v21 = vpop.f32.mrb[1].mxu0 }
  0xef   : > { %v389_v23 = vadd.f32 %v388_v21, %v275_v18  ;;  %v390_v24 = vpop.f32.mrb[2].mxu0 }
  0xf0   : > { %v425_v25 = vmul.f32 0.2, %v387_v20  ;;  %v391_v26 = vadd.f32 %v390_v24, %v280_v22  ;;  %v392_v27 = vpop.f32.mrb[3].mxu0 }
  0xf1   : > { %v426_v29 = vmul.f32 0.2, %v389_v23  ;;  %v393_v30 = vadd.f32 %v392_v27, %v280_v22  ;;  %v310_v22 = vpop.permute.xlu1 %309 }
  0xf2   : > { %v441_v31 = vmax.f32 %v387_v20, %v425_v25  ;;  %v427_v32 = vmul.f32 0.2, %v391_v26 }
  0xf3   : > { %v442_v33 = vmax.f32 %v389_v23, %v426_v29  ;;  %v428_v34 = vmul.f32 0.2, %v393_v30 }
  0xf4   : > { %v443_v35 = vmax.f32 %v391_v26, %v427_v32 }
  0xf5   : > { %v444_v36 = vmax.f32 %v393_v30, %v428_v34  ;;  %v396_v37 = vpop.f32.mrb[4].mxu0  ;;  %v457_v38 = vadd.f32 %v442_v33, %v441_v31 }
  0xf6   : > { %v860_v39 = vpack.c.bf16 %v443_v35, %v441_v31  ;;  %v397_v40 = vadd.f32 %v396_v37, %v285_v28  ;;  %v398_v41 = vpop.f32.mrb[5].mxu0 }
  0xf7   : > { %v399_v43 = vadd.f32 %v398_v41, %v285_v28  ;;  %v400_v44 = vpop.f32.mrb[6].mxu0  ;;  %458 = vadd.xlane.f32.xlu0 %v457_v38  ;;  %v460_v45 = vadd.f32 %v444_v36, %v443_v35  ;;  %v491_v46 = vpack.c.bf16 %v444_v36, %v442_v33 }
  0xf8   : > { %v429_v47 = vmul.f32 0.2, %v397_v40  ;;  %v401_v48 = vadd.f32 %v400_v44, %v290_v42  ;;  %v402_v49 = vpop.f32.mrb[7].mxu0 }
  0xf9   : > { %v430_v50 = vmul.f32 0.2, %v399_v43  ;;  %v403_v51 = vadd.f32 %v402_v49, %v290_v42  ;;  %461 = vadd.xlane.f32.xlu1 %v460_v45  ;;  %498 = vmatprep.subr.bf16.mxu0 %v491_v46 }
  0xfa   : > { %v445_v52 = vmax.f32 %v397_v40, %v429_v47  ;;  %v431_v53 = vmul.f32 0.2, %v401_v48  ;;  %706 = vmatprep.subr.bf16.mxu1 %v491_v46  ;;  %530 = vmatprep.mubr.bf16.mxu0 %v491_v46 }
  0xfb   : > { %v446_v54 = vmax.f32 %v399_v43, %v430_v50  ;;  %v432_v55 = vmul.f32 0.2, %v403_v51  ;;  %499 = vmatpush1.bf16.xpose.msra.mxu0 %v860_v39  ;;  %710 = vmatpush1.bf16.xpose.msra.mxu1 %v860_v39 }
  0xfc   : > { %v447_v56 = vmax.f32 %v401_v48, %v431_v53 }
  0xfd   : > { %v448_v58 = vmax.f32 %v403_v51, %v432_v55  ;;  %v406_v59 = vpop.f32.mrb[8].mxu0  ;;  %v463_v60 = vadd.f32 %v446_v54, %v445_v52 }
  0xfe   : > { %v864_v61 = vpack.c.bf16 %v447_v56, %v445_v52  ;;  %v407_v62 = vadd.f32 %v406_v59, %v295_v57  ;;  %v408_v63 = vpop.f32.mrb[9].mxu0 }
  0xff   : > { %v409_v1 = vadd.f32 %v408_v63, %v295_v57  ;;  %v410_v2 = vpop.f32.mrb[10].mxu0  ;;  %464 = vadd.xlane.f32.xlu0 %v463_v60  ;;  %v493_v3 = vpack.c.bf16 %v448_v58, %v446_v54  ;;  %v466_v4 = vadd.f32 %v448_v58, %v447_v56 }
 0x100   : > { %v433_v5 = vmul.f32 0.2, %v407_v62  ;;  %v411_v6 = vadd.f32 %v410_v2, %v300_v0  ;;  %v412_v7 = vpop.f32.mrb[11].mxu0 }
 0x101   : > { %v434_v8 = vmul.f32 0.2, %v409_v1  ;;  %v413_v9 = vadd.f32 %v412_v7, %v300_v0  ;;  %500 = vmatprep.subr.bf16.mxu0 %v493_v3  ;;  %707 = vmatprep.subr.bf16.mxu1 %v493_v3 }
 0x102   : > { %v449_v10 = vmax.f32 %v407_v62, %v433_v5  ;;  %v435_v11 = vmul.f32 0.2, %v411_v6  ;;  %538 = vmatprep.mubr.bf16.mxu1 %v493_v3 }
 0x103   : > { %v450_v12 = vmax.f32 %v409_v1, %v434_v8  ;;  %v436_v13 = vmul.f32 0.2, %v413_v9  ;;  %501 = vmatpush1.bf16.xpose.msra.mxu0 %v864_v61  ;;  %711 = vmatpush1.bf16.xpose.msra.mxu1 %v864_v61 }
 0x104   : > { %v451_v14 = vmax.f32 %v411_v6, %v435_v11  ;;  %467 = vadd.xlane.f32.xlu0 %v466_v4 }
 0x105   : > { %v452_v16 = vmax.f32 %v413_v9, %v436_v13  ;;  %v416_v17 = vpop.f32.mrb[12].mxu0  ;;  %v469_v18 = vadd.f32 %v450_v12, %v449_v10 }
 0x106   : > { %v494_v19 = vpack.c.bf16 %v451_v14, %v449_v10  ;;  %v417_v20 = vadd.f32 %v416_v17, %v305_v15  ;;  %v418_v21 = vpop.f32.mrb[13].mxu0 }
 0x107   : > { %v419_v23 = vadd.f32 %v418_v21, %v305_v15  ;;  %v420_v24 = vpop.f32.mrb[14].mxu0  ;;  %470 = vadd.xlane.f32.xlu1 %v469_v18  ;;  %v495_v25 = vpack.c.bf16 %v452_v16, %v450_v12  ;;  %v472_v26 = vadd.f32 %v452_v16, %v451_v14 }
 0x108   : > { %v437_v27 = vmul.f32 0.2, %v417_v20  ;;  %v421_v28 = vadd.f32 %v420_v24, %v310_v22  ;;  %v422_v29 = vpop.f32.mrb[15].mxu0 }
 0x109   : > { %v438_v30 = vmul.f32 0.2, %v419_v23  ;;  %v423_v31 = vadd.f32 %v422_v29, %v310_v22  ;;  %502 = vmatprep.subr.bf16.mxu0 %v495_v25  ;;  %708 = vmatprep.subr.bf16.mxu1 %v495_v25 }
 0x10a   : > { %v453_v32 = vmax.f32 %v417_v20, %v437_v27  ;;  %v439_v33 = vmul.f32 0.2, %v421_v28  ;;  %473 = vadd.xlane.f32.xlu0 %v472_v26 }
 0x10b   : > { %v454_v34 = vmax.f32 %v419_v23, %v438_v30  ;;  %v440_v35 = vmul.f32 0.2, %v423_v31  ;;  %503 = vmatpush1.bf16.xpose.msra.mxu0 %v494_v19  ;;  %712 = vmatpush1.bf16.xpose.msra.mxu1 %v494_v19 }
 0x10c   : > { %v455_v36 = vmax.f32 %v421_v28, %v439_v33 }
 0x10d   : > { %v456_v37 = vmax.f32 %v423_v31, %v440_v35  ;;  %v475_v38 = vadd.f32 %v454_v34, %v453_v32 }
 0x10e   : > { %v496_v40 = vpack.c.bf16 %v455_v36, %v453_v32 }
 0x10f   : > { %476 = vadd.xlane.f32.xlu1 %v475_v38  ;;  %v497_v41 = vpack.c.bf16 %v456_v37, %v454_v34  ;;  %v478_v42 = vadd.f32 %v456_v37, %v455_v36 }
 0x111   : > { %504 = vmatprep.subr.bf16.mxu0 %v497_v41  ;;  %709 = vmatprep.subr.bf16.mxu1 %v497_v41 }
 0x112   : > { %479 = vadd.xlane.f32.xlu0 %v478_v42 }
 0x113   : > { %505 = vmatpush1.bf16.xpose.msra.mxu0 %v496_v40  ;;  %713 = vmatpush1.bf16.xpose.msra.mxu1 %v496_v40 }
 0x11a   : > { %531 = vmatmul.mubr.bf16.vlgmr.msra.gmra.mrb[16].mxu0 %v860_v39  ;;  %539 = vmatmul.mubr.bf16.vlgmr.msra.gmra.mrb[0].mxu1 %v864_v61 }
 0x11b   : > { %546 = vmatprep.mubr.bf16.mxu1 %v495_v25 }
 0x122   : > { %547 = vmatmul.mubr.bf16.gmra.mrb[4].mxu1 %v494_v19 }
 0x123   : > { %554 = vmatprep.mubr.bf16.mxu1 %v497_v41 }
 0x12a   : > { %555 = vmatmul.mubr.bf16.gmra.mrb[8].mxu1 %v496_v40 }
 0x184   : > { %v459_v43 = vpop.xlane.xlu0 %458 }
 0x185   : > { %482 = vst.msk [vmem:[%s240_s28] sm:$0xff] %vm481_vm2, %v459_v43 }
 0x186   : > { %v462_v44 = vpop.xlane.xlu1 %461 }
 0x187   : > { %483 = vst.msk [vmem:[%s240_s28 + $0x8] sm:$0xff] %vm481_vm2, %v462_v44 }
 0x18c   : > { %v465_v45 = vpop.xlane.xlu0 %464 }
 0x18d   : > { %484 = vst.msk [vmem:[%s240_s28 + $0x10] sm:$0xff] %vm481_vm2, %v465_v45 }
 0x191   : > { %v468_v39 = vpop.xlane.xlu0 %467 }
 0x192   : > { %485 = vst.msk [vmem:[%s240_s28 + $0x18] sm:$0xff] %vm481_vm2, %v468_v39 }
 0x194   : > { %v471_v46 = vpop.xlane.xlu1 %470 }
 0x195   : > { %486 = vst.msk [vmem:[%s240_s28 + $0x20] sm:$0xff] %vm481_vm2, %v471_v46 }
 0x197   : > { %v474_v47 = vpop.xlane.xlu0 %473 }
 0x198   : > { %487 = vst.msk [vmem:[%s240_s28 + $0x28] sm:$0xff] %vm481_vm2, %v474_v47 }
 0x19c   : > { %v477_v48 = vpop.xlane.xlu1 %476 }
 0x19d   : > { %488 = vst.msk [vmem:[%s240_s28 + $0x30] sm:$0xff] %vm481_vm2, %v477_v48 }
 0x19f   : > { %v480_v49 = vpop.xlane.xlu0 %479 }
 0x1a0   : > { %489 = vst.msk [vmem:[%s240_s28 + $0x38] sm:$0xff] %vm481_vm2, %v480_v49 }
 0x1ed   : > { %v532_v50 = vpop.f32.mrb[16].mxu0  ;;  %v540_v51 = vpop.f32.mrb[0].mxu1 }
 0x1ee   : > { %564 = vst.msk [vmem:[%s247_s30] sm:$0xff] %vm563_vm3, %v532_v50  ;;  %566 = vst.msk [vmem:[%s247_s30 + $0x10] sm:$0xff] %vm563_vm3, %v540_v51  ;;  %v534_v52 = vpop.f32.mrb[17].mxu0  ;;  %v542_v53 = vpop.f32.mrb[1].mxu1 }
 0x1ef   : > { %v535_v54 = vpop.f32.mrb[18].mxu0  ;;  %v543_v55 = vpop.f32.mrb[2].mxu1 }
 0x1f0   : > { %565 = vst.msk [vmem:[%s247_s30 + $0x8] sm:$0xff] %vm563_vm3, %v535_v54  ;;  %567 = vst.msk [vmem:[%s247_s30 + $0x18] sm:$0xff] %vm563_vm3, %v543_v55  ;;  %v537_v56 = vpop.f32.mrb[19].mxu0  ;;  %v545_v57 = vpop.f32.mrb[3].mxu1 }
 0x1f5   : > { %v548_v58 = vpop.f32.mrb[4].mxu1 }
 0x1f6   : > { %568 = vst.msk [vmem:[%s247_s30 + $0x20] sm:$0xff] %vm563_vm3, %v548_v58  ;;  %v550_v59 = vpop.f32.mrb[5].mxu1 }
 0x1f7   : > { %v551_v60 = vpop.f32.mrb[6].mxu1 }
 0x1f8   : > { %569 = vst.msk [vmem:[%s247_s30 + $0x28] sm:$0xff] %vm563_vm3, %v551_v60  ;;  %v553_v61 = vpop.f32.mrb[7].mxu1 }
 0x1fd   : > { %v556_v62 = vpop.f32.mrb[8].mxu1 }
 0x1fe   : > { %570 = vst.msk [vmem:[%s247_s30 + $0x30] sm:$0xff] %vm563_vm3, %v556_v62  ;;  %v558_v63 = vpop.f32.mrb[9].mxu1 }
 0x1ff   : > { %v559_v0 = vpop.f32.mrb[10].mxu1 }
 0x200   : > { %571 = vst.msk [vmem:[%s247_s30 + $0x38] sm:$0xff] %vm563_vm3, %v559_v0  ;;  %v561_v1 = vpop.f32.mrb[11].mxu1 }
 0x201 PF: > { %s15_s17 = sadd.s32 1, %s768_s17   ;;  %s907_s15 = smov %s764_s16 }
 0x202   : > { %p12_p5 = scmp.ge.s32.totalorder %s15_s17, 4   ;;  %s908_s16 = smov %s910_s18 }
 0x204   :  { %14 = sbr.rel (!%p12_p5) target bundleno = 2 (0x2), region = 74 }

// kernel: pixel_discriminator_forward.3
= control target key start
LH: loop header
LB: loop body
LE: loop exit
PB: predicated region body
PF: predicated region fallthrough
CT: control target
= control target key end

     0   :  { %s1197_s26 = smov 0   ;;  %s1199_s27 = smov 0   ;;  %s1372_s0 = inlined_call_operand.vmem [shape: f32[2,4,256], index: 0, kind: input, shape index: {}]   ;;  %s1373_s1 = inlined_call_operand.vmem [shape: bf16[64,4], index: 1, kind: input, shape index: {}]   ;;  %s1374_s2 = inlined_call_operand.vmem [shape: f32[64,1], index: 2, kind: input, shape index: {}]   ;;  %s1375_s3 = inlined_call_operand.vmem [shape: bf16[128,64], index: 3, kind: input, shape index: {}]   ;;  %s1376_s4 = inlined_call_operand.vmem [shape: f32[128,1], index: 4, kind: input, shape index: {}]   ;;  %s1377_s5 = inlined_call_operand.vmem [shape: bf16[1,128], index: 5, kind: input, shape index: {}]   ;;  %s1378_s6 = inlined_call_operand.<no memory space> [shape: f32[1,1], index: 6, kind: input, shape index: {}]   ;;  %s1379_s7 = inlined_call_operand.vmem [shape: f32[2,1,256], index: 7, kind: output, shape index: {}]  }
   0x1   :  { %12 = sst [smem:[#allocation2]] %s1378_s6  ;;  %s1201_s28 = smov 0  }
   0x2 LB: > { %s30_s6 = sadd.s32 1, %s1146_s27  ;;  %p1055_p0 = scmp.ge.s32.totalorder %s1150_s28, 1  ;;  %s1150_s28 = sphi %s1201_s28, %s18_s28   ;;  %s1146_s27 = sphi %s1199_s27, %s1381_s27   ;;  %s1142_s26 = sphi %s1197_s26, %s1380_s26  }
   0x3   : > { %p32_p1 = scmp.ge.s32.totalorder %s30_s6, 2  ;;  %p259_p2 = scmp.lt.s32.totalorder %s1150_s28, 3 }
   0x5   : > { %s1383_s6 = smov (%p32_p1, %s30_s6), 0  ;;  %p260_p3 = pnand %p1055_p0, %p259_p2 }
   0x6   : > { %p299_p4 = scmp.lt.s32.totalorder (!%p260_p3), %s1142_s26, 1  ;;  %v1152_v0 = vmov (!%p260_p3), 0   ;;  %v332_v1 = vld [vmem:[%s1374_s2] sm:$0xff] (!%p260_p3)  ;;  %v334_v2 = vld [vmem:[%s1374_s2 + $0x10] sm:$0xff] (!%p260_p3)  ;;  %vm413_vm0 = vcmask (!%p260_p3), 1041408   ;;  %v333_v4 = vld [vmem:[%s1374_s2 + $0x8] sm:$0xff] (!%p260_p3) }
   0x7   : > { %263 = sbr.rel (%p260_p3) target bundleno = 782 (0x30e), region = 48  ;;  %452 = vmatprep.mubr.bf16.mxu0 (!%p260_p3), %v1152_v0  ;;  %1113 = vset.pattern.permute.xlu0 (!%p260_p3), %v1152_v0  ;;  %v335_v5 = vld [vmem:[%s1374_s2 + $0x18] sm:$0xff] (!%p260_p3)  ;;  %v336_v10 = vld [vmem:[%s1374_s2 + $0x20] sm:$0xff] (!%p260_p3)  ;;  %v337_v11 = vld [vmem:[%s1374_s2 + $0x28] sm:$0xff] (!%p260_p3)  ;;  %vm400_vm1 = vcmask (!%p260_p3), 31744   ;;  %vm685_vm2 = vcmask (!%p260_p3), 523264  }
   0x8   : > { %1114 = vset.pattern.permute.xlu1 (!%p260_p3), %v1152_v0  ;;  %742 = vmatprep.mubr.bf16.mxu1 (!%p260_p3), %v1152_v0  ;;  %v1116_v12 = vld [vmem:[%s1373_s1] sm:$0xff] (!%p260_p3)   ;;  %v338_v13 = vld [vmem:[%s1374_s2 + $0x30] sm:$0xff] (!%p260_p3)  ;;  %v339_v14 = vld [vmem:[%s1374_s2 + $0x38] sm:$0xff] (!%p260_p3)  ;;  %s904_s24 = sld [smem:[#allocation2]] (!%p260_p3) }
   0x9   : > { %342 = vperm.xlu0 (!%p260_p3), %1113, %v332_v1   ;;  %352 = vperm.xlu1 (!%p260_p3), %1114, %v334_v2   ;;  %v549_v15 = vld [vmem:[%s1376_s4] sm:$0xff] (!%p260_p3)  ;;  %v550_v16 = vld [vmem:[%s1376_s4 + $0x8] sm:$0xff] (!%p260_p3)  ;;  %v551_v18 = vld [vmem:[%s1376_s4 + $0x10] sm:$0xff] (!%p260_p3) }
   0xa   : > { %v1117_v17 = vld [vmem:[%s1373_s1 + $0x8] sm:$0xff] (!%p260_p3)   ;;  %v552_v19 = vld [vmem:[%s1376_s4 + $0x18] sm:$0xff] (!%p260_p3)  ;;  %v553_v20 = vld [vmem:[%s1376_s4 + $0x20] sm:$0xff] (!%p260_p3) }
   0xb   : > { %v554_v21 = vld [vmem:[%s1376_s4 + $0x28] sm:$0xff] (!%p260_p3)  ;;  %v1118_v22 = vld [vmem:[%s1373_s1 + $0x10] sm:$0xff] (!%p260_p3)   ;;  %v556_v24 = vld [vmem:[%s1376_s4 + $0x38] sm:$0xff] (!%p260_p3) }
   0xc   : > { %v555_v23 = vld [vmem:[%s1376_s4 + $0x30] sm:$0xff] (!%p260_p3)  ;;  %v557_v25 = vld [vmem:[%s1376_s4 + $0x40] sm:$0xff] (!%p260_p3)  ;;  %v558_v26 = vld [vmem:[%s1376_s4 + $0x48] sm:$0xff] (!%p260_p3) }
   0xd   : > { %347 = vperm.xlu0 (!%p260_p3), %1113, %v333_v4   ;;  %357 = vperm.xlu1 (!%p260_p3), %1114, %v335_v5   ;;  %v1119_v27 = vld [vmem:[%s1373_s1 + $0x18] sm:$0xff] (!%p260_p3)   ;;  %v559_v28 = vld [vmem:[%s1376_s4 + $0x50] sm:$0xff] (!%p260_p3)  ;;  %v561_v30 = vld [vmem:[%s1376_s4 + $0x60] sm:$0xff] (!%p260_p3) }
   0xe   : > { %s1385_s26 = smov (!%p299_p4, %s1142_s26), 1  ;;  %v560_v29 = vld [vmem:[%s1376_s4 + $0x58] sm:$0xff]  ;;  %v562_v31 = vld [vmem:[%s1376_s4 + $0x68] sm:$0xff]  ;;  %v563_v32 = vld [vmem:[%s1376_s4 + $0x70] sm:$0xff] }
   0xf   : > { %s1086_s29 = sshll.u32 %s1385_s26, 3  ;;  %v564_v33 = vld [vmem:[%s1376_s4 + $0x78] sm:$0xff]  ;;  %s1058_s25 = sshll.u32 %s1385_s26, 1 }
  0x10   : > { %s306_s13 = scalar_lea.vmem %s1372_s0, %s1086_s29  ;;  %s315_s8 = scalar_lea.vmem %s1379_s7, %s1058_s25 }
  0x11   : > { %v318_v3 = vld [vmem:[%s306_s13] sm:$0xff]  ;;  %362 = vperm.xlu0 %1113, %v336_v10   ;;  %367 = vperm.xlu1 %1114, %v337_v11  }
  0x12   : > { %v320_v6 = vcombine.high %v318_v3, %v318_v3  ;;  %v322_v7 = vpack.c.bf16 %v318_v3, %v318_v3 }
  0x14   : > { %v323_v8 = vpack.c.bf16 %v320_v6, %v320_v6  ;;  %v415_v9 = vsel %vm413_vm0, %v322_v7, 0 }
  0x15   : > { %372 = vperm.xlu0 %1113, %v338_v13   ;;  %377 = vperm.xlu1 %1114, %v339_v14  }
  0x16   : > { %1063 = vmatprep.subr.msk.bf16.mxu0 %vm413_vm0, %v323_v8 }
  0x17   : > { %421 = vmatpush1.bf16.msra.mxu0 %v415_v9 }
  0x19   : > { %567 = vperm.xlu0 %1113, %v549_v15   ;;  %572 = vperm.xlu1 %1114, %v550_v16  }
  0x1a   : > { %1064 = vmatmul.mubr.msk.bf16.vlgmr.msra.gmra.mrb[0].mxu0 %vm400_vm1, %v1116_v12 }
  0x1b   : > { %462 = vmatprep.mubr.bf16.mxu0 %v1152_v0 }
  0x1d   : > { %577 = vperm.xlu0 %1113, %v551_v18   ;;  %582 = vperm.xlu1 %1114, %v552_v19  }
  0x21   : > { %587 = vperm.xlu0 %1113, %v553_v20   ;;  %592 = vperm.xlu1 %1114, %v554_v21  }
  0x22   : > { %1065 = vmatmul.mubr.msk.bf16.gmra.mrb[4].mxu0 %vm400_vm1, %v1117_v17 }
  0x23   : > { %472 = vmatprep.mubr.bf16.mxu0 %v1152_v0 }
  0x25   : > { %597 = vperm.xlu0 %1113, %v555_v23   ;;  %602 = vperm.xlu1 %1114, %v556_v24  }
  0x29   : > { %607 = vperm.xlu0 %1113, %v557_v25   ;;  %612 = vperm.xlu1 %1114, %v558_v26  }
  0x2a   : > { %1066 = vmatmul.mubr.msk.bf16.gmra.mrb[8].mxu0 %vm400_vm1, %v1118_v22 }
  0x2b   : > { %482 = vmatprep.mubr.bf16.mxu0 %v1152_v0 }
  0x2d   : > { %617 = vperm.xlu0 %1113, %v559_v28   ;;  %622 = vperm.xlu1 %1114, %v560_v29  }
  0x31   : > { %627 = vperm.xlu0 %1113, %v561_v30   ;;  %632 = vperm.xlu1 %1114, %v562_v31  }
  0x32   : > { %1067 = vmatmul.mubr.msk.bf16.gmra.mrb[12].mxu0 %vm400_vm1, %v1119_v27 }
  0x33   : > { %938 = vmatprep.mubr.bf16.mxu0 %v1152_v0 }
  0x35   : > { %637 = vperm.xlu0 %1113, %v563_v32   ;;  %642 = vperm.xlu1 %1114, %v564_v33  }
  0x88   : > { %v343_v34 = vpop.permute.xlu0 %342  ;;  %v353_v44 = vpop.permute.xlu1 %352 }
  0x8c   : > { %v348_v38 = vpop.permute.xlu0 %347  ;;  %v358_v57 = vpop.permute.xlu1 %357 }
  0x90   : > { %v363_v7 = vpop.permute.xlu0 %362  ;;  %v368_v14 = vpop.permute.xlu1 %367 }
  0x94   : > { %v373_v27 = vpop.permute.xlu0 %372 }
  0xed   : > { %v454_v35 = vpop.f32.mrb[0].mxu0 }
  0xee   : > { %v455_v36 = vadd.f32 %v454_v35, %v343_v34  ;;  %v456_v37 = vpop.f32.mrb[1].mxu0 }
  0xef   : > { %v457_v39 = vadd.f32 %v456_v37, %v343_v34  ;;  %v458_v40 = vpop.f32.mrb[2].mxu0  ;;  %v378_v34 = vpop.permute.xlu1 %377 }
  0xf0   : > { %v493_v41 = vmul.f32 0.2, %v455_v36  ;;  %v459_v42 = vadd.f32 %v458_v40, %v348_v38  ;;  %v460_v43 = vpop.f32.mrb[3].mxu0 }
  0xf1   : > { %v494_v45 = vmul.f32 0.2, %v457_v39  ;;  %v461_v46 = vadd.f32 %v460_v43, %v348_v38 }
  0xf2   : > { %v495_v47 = vmul.f32 0.2, %v459_v42  ;;  %v509_v49 = vmax.f32 %v455_v36, %v493_v41 }
  0xf3   : > { %v496_v48 = vmul.f32 0.2, %v461_v46  ;;  %v510_v52 = vmax.f32 %v457_v39, %v494_v45 }
  0xf4   : > { %v511_v50 = vmax.f32 %v459_v42, %v495_v47 }
  0xf5   : > { %v464_v51 = vpop.f32.mrb[4].mxu0  ;;  %v512_v53 = vmax.f32 %v461_v46, %v496_v48 }
  0xf6   : > { %v465_v54 = vadd.f32 %v464_v51, %v353_v44  ;;  %v466_v55 = vpop.f32.mrb[5].mxu0  ;;  %v541_v56 = vpack.c.bf16 %v511_v50, %v509_v49  ;;  %v1120_v51 = vld [vmem:[%s1375_s3] sm:$0xff]  }
  0xf7   : > { %v467_v58 = vadd.f32 %v466_v55, %v353_v44  ;;  %v468_v59 = vpop.f32.mrb[6].mxu0  ;;  %v542_v60 = vpack.c.bf16 %v512_v53, %v510_v52  ;;  %v1121_v52 = vld [vmem:[%s1375_s3 + $0x8] sm:$0xff]   ;;  %v1122_v53 = vld [vmem:[%s1375_s3 + $0x10] sm:$0xff]   ;;  %v1124_v55 = vld [vmem:[%s1375_s3 + $0x20] sm:$0xff]  }
  0xf8   : > { %v497_v61 = vmul.f32 0.2, %v465_v54  ;;  %v469_v62 = vadd.f32 %v468_v59, %v358_v57  ;;  %v470_v63 = vpop.f32.mrb[7].mxu0  ;;  %v568_v59 = vpop.permute.xlu0 %567 }
  0xf9   : > { %v498_v1 = vmul.f32 0.2, %v467_v58  ;;  %v471_v2 = vadd.f32 %v470_v63, %v358_v57  ;;  %710 = vmatprep.subr.bf16.mxu1 %v542_v60  ;;  %v1126_v57 = vld [vmem:[%s1375_s3 + $0x30] sm:$0xff]   ;;  %v573_v63 = vpop.permute.xlu1 %572 }
  0xfa   : > { %v499_v3 = vmul.f32 0.2, %v469_v62  ;;  %711 = vmatpush1.bf16.msra.mxu1 %v541_v56  ;;  %v513_v5 = vmax.f32 %v465_v54, %v497_v61  ;;  %v1123_v54 = vld [vmem:[%s1375_s3 + $0x18] sm:$0xff]   ;;  %v1125_v56 = vld [vmem:[%s1375_s3 + $0x28] sm:$0xff]  }
  0xfb   : > { %v500_v4 = vmul.f32 0.2, %v471_v2  ;;  %v514_v8 = vmax.f32 %v467_v58, %v498_v1  ;;  %v1127_v58 = vld [vmem:[%s1375_s3 + $0x38] sm:$0xff]  }
  0xfc   : > { %v515_v6 = vmax.f32 %v469_v62, %v499_v3 }
  0xfd   : > { %v516_v9 = vmax.f32 %v471_v2, %v500_v4  ;;  %v474_v10 = vpop.f32.mrb[8].mxu0 }
  0xfe   : > { %v475_v11 = vadd.f32 %v474_v10, %v363_v7  ;;  %v476_v12 = vpop.f32.mrb[9].mxu0  ;;  %v543_v13 = vpack.c.bf16 %v515_v6, %v513_v5 }
  0xff   : > { %v477_v15 = vadd.f32 %v476_v12, %v363_v7  ;;  %v478_v16 = vpop.f32.mrb[10].mxu0  ;;  %v544_v17 = vpack.c.bf16 %v516_v9, %v514_v8 }
 0x100   : > { %v501_v18 = vmul.f32 0.2, %v475_v11  ;;  %v479_v19 = vadd.f32 %v478_v16, %v368_v14  ;;  %v480_v20 = vpop.f32.mrb[11].mxu0 }
 0x101   : > { %v502_v21 = vmul.f32 0.2, %v477_v15  ;;  %v481_v22 = vadd.f32 %v480_v20, %v368_v14  ;;  %712 = vmatprep.subr.bf16.mxu1 %v544_v17 }
 0x102   : > { %v503_v23 = vmul.f32 0.2, %v479_v19  ;;  %713 = vmatpush1.bf16.msra.mxu1 %v543_v13  ;;  %v517_v25 = vmax.f32 %v475_v11, %v501_v18  ;;  %v578_v11 = vpop.permute.xlu0 %577  ;;  %v583_v18 = vpop.permute.xlu1 %582 }
 0x103   : > { %v504_v24 = vmul.f32 0.2, %v481_v22  ;;  %v518_v28 = vmax.f32 %v477_v15, %v502_v21 }
 0x104   : > { %v519_v26 = vmax.f32 %v479_v19, %v503_v23 }
 0x105   : > { %v520_v29 = vmax.f32 %v481_v22, %v504_v24  ;;  %v484_v30 = vpop.f32.mrb[12].mxu0 }
 0x106   : > { %v485_v31 = vadd.f32 %v484_v30, %v373_v27  ;;  %v486_v32 = vpop.f32.mrb[13].mxu0  ;;  %v545_v33 = vpack.c.bf16 %v519_v26, %v517_v25 }
 0x107   : > { %v487_v35 = vadd.f32 %v486_v32, %v373_v27  ;;  %v488_v36 = vpop.f32.mrb[14].mxu0  ;;  %v546_v37 = vpack.c.bf16 %v520_v29, %v518_v28 }
 0x108   : > { %v505_v38 = vmul.f32 0.2, %v485_v31  ;;  %v489_v39 = vadd.f32 %v488_v36, %v378_v34  ;;  %v490_v40 = vpop.f32.mrb[15].mxu0 }
 0x109   : > { %v506_v41 = vmul.f32 0.2, %v487_v35  ;;  %v491_v42 = vadd.f32 %v490_v40, %v378_v34  ;;  %714 = vmatprep.subr.bf16.mxu1 %v546_v37 }
 0x10a   : > { %v507_v43 = vmul.f32 0.2, %v489_v39  ;;  %715 = vmatpush1.bf16.msra.mxu1 %v545_v33  ;;  %v521_v45 = vmax.f32 %v485_v31, %v505_v38  ;;  %v588_v31 = vpop.permute.xlu0 %587  ;;  %v593_v38 = vpop.permute.xlu1 %592 }
 0x10b   : > { %v508_v44 = vmul.f32 0.2, %v491_v42  ;;  %v522_v47 = vmax.f32 %v487_v35, %v506_v41 }
 0x10c   : > { %v523_v46 = vmax.f32 %v489_v39, %v507_v43 }
 0x10d   : > { %v524_v48 = vmax.f32 %v491_v42, %v508_v44 }
 0x10e   : > { %v547_v49 = vpack.c.bf16 %v523_v46, %v521_v45 }
 0x10f   : > { %v548_v50 = vpack.c.bf16 %v524_v48, %v522_v47 }
 0x111   : > { %716 = vmatprep.subr.bf16.mxu1 %v548_v50 }
 0x112   : > { %717 = vmatpush1.bf16.msra.mxu1 %v547_v49 }
 0x115   : > { %1076 = vmatmul.mubr.msk.bf16.vlgmr.msra.gmra.mrb[0].mxu1 %vm685_vm2, %v1120_v51  ;;  %v598_v51 = vpop.permute.xlu0 %597 }
 0x116   : > { %752 = vmatprep.mubr.bf16.mxu1 %v1152_v0 }
 0x11d   : > { %1077 = vmatmul.mubr.msk.bf16.gmra.mrb[4].mxu1 %vm685_vm2, %v1121_v52 }
 0x11e   : > { %762 = vmatprep.mubr.bf16.mxu1 %v1152_v0 }
 0x125   : > { %1078 = vmatmul.mubr.msk.bf16.gmra.mrb[8].mxu1 %vm685_vm2, %v1122_v53 }
 0x126   : > { %772 = vmatprep.mubr.bf16.mxu1 %v1152_v0 }
 0x12d   : > { %1079 = vmatmul.mubr.msk.bf16.gmra.mrb[12].mxu1 %vm685_vm2, %v1123_v54 }
 0x12e   : > { %782 = vmatprep.mubr.bf16.mxu1 %v1152_v0 }
 0x135   : > { %1080 = vmatmul.mubr.msk.bf16.gmra.mrb[16].mxu1 %vm685_vm2, %v1124_v55 }
 0x136   : > { %792 = vmatprep.mubr.bf16.mxu1 %v1152_v0 }
 0x13d   : > { %1081 = vmatmul.mubr.msk.bf16.gmra.mrb[20].mxu1 %vm685_vm2, %v1125_v56 }
 0x13e   : > { %802 = vmatprep.mubr.bf16.mxu1 %v1152_v0 }
 0x145   : > { %1082 = vmatmul.mubr.msk.bf16.gmra.mrb[24].mxu1 %vm685_vm2, %v1126_v57 }
 0x146   : > { %812 = vmatprep.mubr.bf16.mxu1 %v1152_v0 }
 0x14d   : > { %1083 = vmatmul.mubr.msk.bf16.gmra.mrb[28].mxu1 %vm685_vm2, %v1127_v58  ;;  %v603_v58 = vpop.permute.xlu1 %602 }
 0x1e8   : > { %v744_v60 = vpop.f32.mrb[0].mxu1 }
 0x1e9   : > { %v745_v61 = vadd.f32 %v744_v60, %v568_v59  ;;  %v746_v62 = vpop.f32.mrb[1].mxu1 }
 0x1ea   : > { %v747_v1 = vadd.f32 %v746_v62, %v568_v59  ;;  %v748_v2 = vpop.f32.mrb[2].mxu1 }
 0x1eb   : > { %v823_v3 = vmul.f32 0.2, %v745_v61  ;;  %v749_v4 = vadd.f32 %v748_v2, %v573_v63  ;;  %v750_v5 = vpop.f32.mrb[3].mxu1 }
 0x1ec   : > { %v824_v6 = vmul.f32 0.2, %v747_v1  ;;  %v751_v7 = vadd.f32 %v750_v5, %v573_v63 }
 0x1ed   : > { %v825_v8 = vmul.f32 0.2, %v749_v4  ;;  %v855_v9 = vmax.f32 %v745_v61, %v823_v3 }
 0x1ee   : > { %v826_v0 = vmul.f32 0.2, %v751_v7  ;;  %v856_v12 = vmax.f32 %v747_v1, %v824_v6 }
 0x1ef   : > { %v857_v10 = vmax.f32 %v749_v4, %v825_v8  ;;  %v608_v8 = vpop.permute.xlu0 %607 }
 0x1f0   : > { %v858_v13 = vmax.f32 %v751_v7, %v826_v0  ;;  %v754_v14 = vpop.f32.mrb[4].mxu1 }
 0x1f1   : > { %v888_v15 = vpack.c.bf16 %v857_v10, %v855_v9  ;;  %v755_v16 = vadd.f32 %v754_v14, %v578_v11  ;;  %v756_v17 = vpop.f32.mrb[5].mxu1  ;;  %v613_v14 = vpop.permute.xlu1 %612 }
 0x1f2   : > { %v757_v19 = vadd.f32 %v756_v17, %v578_v11  ;;  %v758_v20 = vpop.f32.mrb[6].mxu1  ;;  %v889_v21 = vpack.c.bf16 %v858_v13, %v856_v12 }
 0x1f3   : > { %v827_v22 = vmul.f32 0.2, %v755_v16  ;;  %v759_v23 = vadd.f32 %v758_v20, %v583_v18  ;;  %v760_v24 = vpop.f32.mrb[7].mxu1 }
 0x1f4   : > { %v828_v25 = vmul.f32 0.2, %v757_v19  ;;  %v761_v26 = vadd.f32 %v760_v24, %v583_v18  ;;  %906 = vmatprep.subr.bf16.mxu0 %v889_v21 }
 0x1f5   : > { %v829_v27 = vmul.f32 0.2, %v759_v23  ;;  %907 = vmatpush1.bf16.msra.mxu0 %v888_v15  ;;  %v859_v29 = vmax.f32 %v755_v16, %v827_v22 }
 0x1f6   : > { %v830_v28 = vmul.f32 0.2, %v761_v26  ;;  %v860_v32 = vmax.f32 %v757_v19, %v828_v25 }
 0x1f7   : > { %v861_v30 = vmax.f32 %v759_v23, %v829_v27  ;;  %v618_v27 = vpop.permute.xlu0 %617 }
 0x1f8   : > { %v862_v33 = vmax.f32 %v761_v26, %v830_v28  ;;  %v764_v34 = vpop.f32.mrb[8].mxu1 }
 0x1f9   : > { %v890_v35 = vpack.c.bf16 %v861_v30, %v859_v29  ;;  %v765_v36 = vadd.f32 %v764_v34, %v588_v31  ;;  %v766_v37 = vpop.f32.mrb[9].mxu1  ;;  %v623_v34 = vpop.permute.xlu1 %622 }
 0x1fa   : > { %v767_v39 = vadd.f32 %v766_v37, %v588_v31  ;;  %v768_v40 = vpop.f32.mrb[10].mxu1  ;;  %v891_v41 = vpack.c.bf16 %v862_v33, %v860_v32 }
 0x1fb   : > { %v831_v42 = vmul.f32 0.2, %v765_v36  ;;  %v769_v43 = vadd.f32 %v768_v40, %v593_v38  ;;  %v770_v44 = vpop.f32.mrb[11].mxu1 }
 0x1fc   : > { %v832_v45 = vmul.f32 0.2, %v767_v39  ;;  %v771_v46 = vadd.f32 %v770_v44, %v593_v38  ;;  %908 = vmatprep.subr.bf16.mxu0 %v891_v41 }
 0x1fd   : > { %v833_v47 = vmul.f32 0.2, %v769_v43  ;;  %909 = vmatpush1.bf16.msra.mxu0 %v890_v35  ;;  %v863_v49 = vmax.f32 %v765_v36, %v831_v42 }
 0x1fe   : > { %v834_v48 = vmul.f32 0.2, %v771_v46  ;;  %v864_v52 = vmax.f32 %v767_v39, %v832_v45 }
 0x1ff   : > { %v865_v50 = vmax.f32 %v769_v43, %v833_v47  ;;  %v628_v47 = vpop.permute.xlu0 %627 }
 0x200   : > { %v866_v53 = vmax.f32 %v771_v46, %v834_v48  ;;  %v774_v54 = vpop.f32.mrb[12].mxu1 }
 0x201   : > { %v892_v55 = vpack.c.bf16 %v865_v50, %v863_v49  ;;  %v775_v56 = vadd.f32 %v774_v54, %v598_v51  ;;  %v776_v57 = vpop.f32.mrb[13].mxu1  ;;  %v633_v54 = vpop.permute.xlu1 %632 }
 0x202   : > { %v777_v59 = vadd.f32 %v776_v57, %v598_v51  ;;  %v778_v60 = vpop.f32.mrb[14].mxu1  ;;  %v893_v61 = vpack.c.bf16 %v866_v53, %v864_v52 }
 0x203   : > { %v835_v62 = vmul.f32 0.2, %v775_v56  ;;  %v779_v63 = vadd.f32 %v778_v60, %v603_v58  ;;  %v780_v1 = vpop.f32.mrb[15].mxu1 }
 0x204   : > { %v836_v2 = vmul.f32 0.2, %v777_v59  ;;  %v781_v3 = vadd.f32 %v780_v1, %v603_v58  ;;  %910 = vmatprep.subr.bf16.mxu0 %v893_v61 }
 0x205   : > { %v837_v4 = vmul.f32 0.2, %v779_v63  ;;  %911 = vmatpush1.bf16.msra.mxu0 %v892_v55  ;;  %v867_v6 = vmax.f32 %v775_v56, %v835_v62 }
 0x206   : > { %v838_v5 = vmul.f32 0.2, %v781_v3  ;;  %v868_v0 = vmax.f32 %v777_v59, %v836_v2 }
 0x207   : > { %v869_v7 = vmax.f32 %v779_v63, %v837_v4  ;;  %v638_v4 = vpop.permute.xlu0 %637 }
 0x208   : > { %v870_v9 = vmax.f32 %v781_v3, %v838_v5  ;;  %v784_v10 = vpop.f32.mrb[16].mxu1 }
 0x209   : > { %v894_v11 = vpack.c.bf16 %v869_v7, %v867_v6  ;;  %v785_v12 = vadd.f32 %v784_v10, %v608_v8  ;;  %v786_v13 = vpop.f32.mrb[17].mxu1  ;;  %v643_v10 = vpop.permute.xlu1 %642 }
 0x20a   : > { %v787_v15 = vadd.f32 %v786_v13, %v608_v8  ;;  %v788_v16 = vpop.f32.mrb[18].mxu1  ;;  %v895_v17 = vpack.c.bf16 %v870_v9, %v868_v0 }
 0x20b   : > { %v839_v18 = vmul.f32 0.2, %v785_v12  ;;  %v789_v19 = vadd.f32 %v788_v16, %v613_v14  ;;  %v790_v20 = vpop.f32.mrb[19].mxu1 }
 0x20c   : > { %v840_v21 = vmul.f32 0.2, %v787_v15  ;;  %v791_v22 = vadd.f32 %v790_v20, %v613_v14  ;;  %912 = vmatprep.subr.bf16.mxu0 %v895_v17 }
 0x20d   : > { %v841_v23 = vmul.f32 0.2, %v789_v19  ;;  %913 = vmatpush1.bf16.msra.mxu0 %v894_v11  ;;  %v871_v25 = vmax.f32 %v785_v12, %v839_v18 }
 0x20e   : > { %v842_v24 = vmul.f32 0.2, %v791_v22  ;;  %v872_v28 = vmax.f32 %v787_v15, %v840_v21 }
 0x20f   : > { %v873_v26 = vmax.f32 %v789_v19, %v841_v23 }
 0x210   : > { %v874_v29 = vmax.f32 %v791_v22, %v842_v24  ;;  %v794_v30 = vpop.f32.mrb[20].mxu1 }
 0x211   : > { %v896_v31 = vpack.c.bf16 %v873_v26, %v871_v25  ;;  %v795_v32 = vadd.f32 %v794_v30, %v618_v27  ;;  %v796_v33 = vpop.f32.mrb[21].mxu1  ;;  %v953_v30 = vlaneseq }
 0x212   : > { %v797_v35 = vadd.f32 %v796_v33, %v618_v27  ;;  %v798_v36 = vpop.f32.mrb[22].mxu1  ;;  %v897_v37 = vpack.c.bf16 %v874_v29, %v872_v28  ;;  %v887_v27 = vld [vmem:[%s1377_s5] sm:$0x1]  ;;  %v1153_v28 = vmov 1966171168  }
 0x213   : > { %v843_v38 = vmul.f32 0.2, %v795_v32  ;;  %v799_v39 = vadd.f32 %v798_v36, %v623_v34  ;;  %v800_v40 = vpop.f32.mrb[23].mxu1  ;;  %v951_v29 = vunpack.c.l.s4 %v1153_v28  ;;  %v954_v33 = vshrl.u32 %v953_v30, 7 }
 0x214   : > { %v844_v41 = vmul.f32 0.2, %v797_v35  ;;  %v801_v42 = vadd.f32 %v800_v40, %v623_v34  ;;  %914 = vmatprep.subr.bf16.mxu0 %v897_v37  ;;  %vm967_vm3 = vcmp.lt.s32.totalorder %v953_v30, 256 }
 0x215   : > { %v845_v43 = vmul.f32 0.2, %v799_v39  ;;  %915 = vmatpush1.bf16.msra.mxu0 %v896_v31  ;;  %v875_v45 = vmax.f32 %v795_v32, %v843_v38  ;;  %v905_v31 = vstv %s904_s24  ;;  %v952_v32 = vunpack.c.0.s8 %v951_v29 }
 0x216   : > { %v846_v44 = vmul.f32 0.2, %v801_v42  ;;  %v876_v48 = vmax.f32 %v797_v35, %v844_v41 }
 0x217   : > { %v877_v46 = vmax.f32 %v799_v39, %v845_v43  ;;  %v955_v38 = vsub.s32 %v952_v32, %v954_v33 }
 0x218   : > { %v878_v49 = vmax.f32 %v801_v42, %v846_v44  ;;  %v804_v50 = vpop.f32.mrb[24].mxu1 }
 0x219   : > { %v898_v51 = vpack.c.bf16 %v877_v46, %v875_v45  ;;  %v805_v52 = vadd.f32 %v804_v50, %v628_v47  ;;  %v806_v53 = vpop.f32.mrb[25].mxu1 }
 0x21a   : > { %v807_v55 = vadd.f32 %v806_v53, %v628_v47  ;;  %v808_v56 = vpop.f32.mrb[26].mxu1  ;;  %v899_v57 = vpack.c.bf16 %v878_v49, %v876_v48 }
 0x21b   : > { %v847_v58 = vmul.f32 0.2, %v805_v52  ;;  %v809_v59 = vadd.f32 %v808_v56, %v633_v54  ;;  %v810_v60 = vpop.f32.mrb[27].mxu1 }
 0x21c   : > { %v848_v61 = vmul.f32 0.2, %v807_v55  ;;  %v811_v62 = vadd.f32 %v810_v60, %v633_v54  ;;  %916 = vmatprep.subr.bf16.mxu0 %v899_v57 }
 0x21d   : > { %v849_v63 = vmul.f32 0.2, %v809_v59  ;;  %917 = vmatpush1.bf16.msra.mxu0 %v898_v51  ;;  %v879_v2 = vmax.f32 %v805_v52, %v847_v58 }
 0x21e   : > { %v850_v1 = vmul.f32 0.2, %v811_v62  ;;  %v880_v5 = vmax.f32 %v807_v55, %v848_v61 }
 0x21f   : > { %v881_v3 = vmax.f32 %v809_v59, %v849_v63 }
 0x220   : > { %v882_v6 = vmax.f32 %v811_v62, %v850_v1  ;;  %v814_v7 = vpop.f32.mrb[28].mxu1 }
 0x221   : > { %v900_v8 = vpack.c.bf16 %v881_v3, %v879_v2  ;;  %v815_v0 = vadd.f32 %v814_v7, %v638_v4  ;;  %v816_v9 = vpop.f32.mrb[29].mxu1 }
 0x222   : > { %v817_v11 = vadd.f32 %v816_v9, %v638_v4  ;;  %v818_v12 = vpop.f32.mrb[30].mxu1  ;;  %v901_v13 = vpack.c.bf16 %v882_v6, %v880_v5 }
 0x223   : > { %v851_v14 = vmul.f32 0.2, %v815_v0  ;;  %v819_v15 = vadd.f32 %v818_v12, %v643_v10  ;;  %v820_v16 = vpop.f32.mrb[31].mxu1 }
 0x224   : > { %v852_v17 = vmul.f32 0.2, %v817_v11  ;;  %v821_v18 = vadd.f32 %v820_v16, %v643_v10  ;;  %918 = vmatprep.subr.bf16.mxu0 %v901_v13 }
 0x225   : > { %v853_v19 = vmul.f32 0.2, %v819_v15  ;;  %919 = vmatpush1.bf16.msra.mxu0 %v900_v8  ;;  %v883_v21 = vmax.f32 %v815_v0, %v851_v14 }
 0x226   : > { %v854_v20 = vmul.f32 0.2, %v821_v18  ;;  %v884_v23 = vmax.f32 %v817_v11, %v852_v17 }
 0x227   : > { %v885_v22 = vmax.f32 %v819_v15, %v853_v19 }
 0x228   : > { %v886_v24 = vmax.f32 %v821_v18, %v854_v20 }
 0x229   : > { %v902_v25 = vpack.c.bf16 %v885_v22, %v883_v21 }
 0x22a   : > { %v903_v26 = vpack.c.bf16 %v886_v24, %v884_v23 }
 0x22c   : > { %920 = vmatprep.subr.bf16.mxu0 %v903_v26 }
 0x22d   : > { %921 = vmatpush1.bf16.msra.mxu0 %v902_v25 }
 0x230   : > { %939 = vmatmul.mubr.bf16.vlgmr.msra.gmra.mrb[16].mxu0 %v887_v27 }
 0x303   : > { %v940_v34 = vpop.f32.mrb[16].mxu0 }
 0x304   : > { %v941_v35 = vadd.f32 %v940_v34, %v905_v31  ;;  %v942_v36 = vpop.f32.mrb[17].mxu0 }
 0x305   : > { %v943_v37 = vadd.f32 %v942_v36, %v905_v31  ;;  %v944_v39 = vpop.f32.mrb[18].mxu0 }
 0x306   : > { %v945_v40 = vpop.f32.mrb[19].mxu0 }
 0x307   : > { %v949_v41 = vcombine.low %v941_v35, %v943_v37 }
 0x309   : > { %v956_v42 = vrot.slane %v949_v41, %v955_v38 }
 0x30b   : > { %v963_v43 = vrot.slane %v956_v42, %v955_v38 }
 0x30d   : > { %969 = vst.msk [vmem:[%s315_s8] sm:$0x3] %vm967_vm3, %v963_v43 }
 0x30e PF: > { %s18_s28 = sadd.s32 1, %s1150_s28   ;;  %s1380_s26 = smov %s1146_s27 }
 0x30f   : > { %p15_p5 = scmp.ge.s32.totalorder %s18_s28, 4   ;;  %s1381_s27 = smov %s1383_s6 }
 0x311   :  { %17 = sbr.rel (!%p15_p5) target bundleno = 2 (0x2), region = 78 }

</bundles_post_ra>
